<compile_context>
chip_gen: v7x
topology: tpu7x:2x2x1
jax: 0.10.0
libtpu: 0.0.40
codegen_flags: <defaults>
</compile_context>

<pallas_src>
import functools

import jax
import jax.numpy as jnp
from jax import lax
from jax.experimental import pallas as pl
from jax.experimental.pallas import tpu as pltpu


def _arcface_ce_kernel(logits_ref, labels_ref, cosm_ref, sinm_ref, th_ref,
                       mm_ref, loss_ref, m_acc, l_acc, t_acc,
                       *, num_classes, scale):
    """One (tb, tc) tile: ArcFace margin + online-logsumexp cross-entropy."""
    k = pl.program_id(1)
    tb, tc = logits_ref.shape

    @pl.when(k == 0)
    def _init():
        m_acc[...] = jnp.full_like(m_acc, -jnp.inf)
        l_acc[...] = jnp.zeros_like(l_acc)
        t_acc[...] = jnp.zeros_like(t_acc)

    cosine = logits_ref[...].astype(jnp.float32)            # (tb, tc)
    labels = labels_ref[...]                                 # (tb, 1) int32

    # global class id of every lane in this tile
    col = k * tc + lax.broadcasted_iota(jnp.int32, (tb, tc), 1)
    is_target = col == labels                                # (tb, tc)

    # ArcFace margin math restricted to the single target column per row.
    cos_t = jnp.sum(jnp.where(is_target, cosine, 0.0), axis=-1, keepdims=True)
    sine_t = jnp.sqrt(jnp.maximum(1.0 - cos_t * cos_t, 0.0))
    phi_t = cos_t * cosm_ref[...] - sine_t * sinm_ref[...]
    phi_t = jnp.where(cos_t > th_ref[...], phi_t, cos_t - mm_ref[...])

    output = scale * jnp.where(is_target, phi_t, cosine)     # (tb, tc)

    # keep out-of-range class lanes out of the softmax; this branch only
    # exists when the class tile does not evenly divide num_classes.
    if num_classes % tc != 0:
        output = jnp.where(col < num_classes, output, jnp.float32(-1e30))

    # target logit is contributed only by the tile holding the label column
    in_tile = jnp.logical_and(labels >= k * tc, labels < k * tc + tc)
    t_acc[...] += jnp.where(in_tile, scale * phi_t, 0.0)

    # online (flash-style) logsumexp over the class axis
    tile_max = jnp.max(output, axis=-1, keepdims=True)
    m_new = jnp.maximum(m_acc[...], tile_max)
    l_acc[...] = (l_acc[...] * jnp.exp(m_acc[...] - m_new)
                  + jnp.sum(jnp.exp(output - m_new), axis=-1, keepdims=True))
    m_acc[...] = m_new

    @pl.when(k == pl.num_programs(1) - 1)
    def _finalize():
        # per-row loss = logsumexp - target_logit
        loss_ref[...] = m_acc[...] + jnp.log(l_acc[...]) - t_acc[...]


def arcface_loss_adaptive_margin(logits, labels, margins, *, s=30.0,
                                 tb=None, tc=None):
    """JAX/Pallas equivalent of ArcFaceLossAdaptiveMargin.forward."""
    batch, out_dim = logits.shape
    if tb is None:
        tb = batch if batch <= 256 else 256          # multiple of 8 or full dim
    if tc is None:
        tc = out_dim if out_dim <= 2048 else 2048    # multiple of 128 or full dim

    # O(batch) per-sample adaptive-margin prep kept as plain JAX wrapper glue.
    ms = margins[labels].astype(jnp.float32)
    cos_m = jnp.cos(ms).reshape(batch, 1)
    sin_m = jnp.sin(ms).reshape(batch, 1)
    th = jnp.cos(jnp.pi - ms).reshape(batch, 1)
    mm = (jnp.sin(jnp.pi - ms) * ms).reshape(batch, 1)
    labels_col = labels.astype(jnp.int32).reshape(batch, 1)

    grid = (pl.cdiv(batch, tb), pl.cdiv(out_dim, tc))
    col_spec = pl.BlockSpec((tb, 1), lambda i, k: (i, 0))

    kernel = functools.partial(_arcface_ce_kernel, num_classes=out_dim,
                               scale=float(s))
    per_row = pl.pallas_call(
        kernel,
        out_shape=jax.ShapeDtypeStruct((batch, 1), jnp.float32),
        grid_spec=pltpu.PrefetchScalarGridSpec(
            num_scalar_prefetch=0,
            grid=grid,
            in_specs=[pl.BlockSpec((tb, tc), lambda i, k: (i, k)),
                      col_spec, col_spec, col_spec, col_spec, col_spec],
            out_specs=col_spec,
            scratch_shapes=[pltpu.VMEM((tb, 1), jnp.float32)] * 3),
        compiler_params=pltpu.CompilerParams(
            dimension_semantics=("parallel", "arbitrary")),
        cost_estimate=pl.CostEstimate(
            flops=6 * batch * out_dim,
            transcendentals=batch * out_dim,
            bytes_accessed=batch * out_dim * logits.dtype.itemsize
            + 6 * batch * 4),
    )(logits, labels_col, cos_m, sin_m, th, mm)
    return jnp.mean(per_row)


def _reference_loss(logits, labels, margins, s=30.0):
    """Pure-JAX reference mirroring the PyTorch module, for verification."""
    out_dim = logits.shape[-1]
    ms = margins[labels].astype(jnp.float32)
    cos_m = jnp.cos(ms)[:, None]
    sin_m = jnp.sin(ms)[:, None]
    th = jnp.cos(jnp.pi - ms)[:, None]
    mm = (jnp.sin(jnp.pi - ms) * ms)[:, None]
    onehot = jax.nn.one_hot(labels, out_dim, dtype=jnp.float32)
    cosine = logits.astype(jnp.float32)
    sine = jnp.sqrt(jnp.maximum(1.0 - cosine ** 2, 0.0))
    phi = cosine * cos_m - sine * sin_m
    phi = jnp.where(cosine > th, phi, cosine - mm)
    output = (onehot * phi + (1.0 - onehot) * cosine) * s
    logprobs = jax.nn.log_softmax(output, axis=-1)
    return (-(logprobs * onehot).sum(-1)).mean()


if __name__ == "__main__":
    # TODO(synk): the PyTorch .cpu().numpy()/.cuda() host round-trips have no
    # Pallas equivalent; device placement is implicit in JAX.
    key = jax.random.PRNGKey(0)
    k_logits, k_labels, k_margins = jax.random.split(key, 3)
    # small shapes that still exercise multiple batch/class tiles and a
    # ragged last class tile (300 % 128 != 0)
    batch, out_dim = 16, 300
    logits = jax.random.uniform(k_logits, (batch, out_dim), jnp.float32,
                                minval=-0.95, maxval=0.95)   # valid cosines
    labels = jax.random.randint(k_labels, (batch,), 0, out_dim, jnp.int32)
    margins = jax.random.uniform(k_margins, (out_dim,), jnp.float32,
                                 minval=0.2, maxval=0.45)

    loss_fn = jax.jit(functools.partial(arcface_loss_adaptive_margin,
                                        s=30.0, tb=8, tc=128))
    loss = jax.block_until_ready(loss_fn(logits, labels, margins))

    ref = _reference_loss(logits, labels, margins, s=30.0)
    assert loss.shape == (), loss.shape
    assert bool(jnp.isfinite(loss))
    assert bool(jnp.allclose(loss, ref, rtol=1e-4, atol=1e-4)), (loss, ref)
    print("KERNEL_OK")
</pallas_src>

<mosaic_0001>
module attributes {stable_mosaic.version = 11 : i64} {
  func.func @_arcface_ce_kernel(%arg0: i32, %arg1: i32, %arg2: memref<8x128xf32, #tpu.memory_space<vmem>>, %arg3: memref<8x1xi32, #tpu.memory_space<vmem>>, %arg4: memref<8x1xf32, #tpu.memory_space<vmem>>, %arg5: memref<8x1xf32, #tpu.memory_space<vmem>>, %arg6: memref<8x1xf32, #tpu.memory_space<vmem>>, %arg7: memref<8x1xf32, #tpu.memory_space<vmem>>, %arg8: memref<8x1xf32, #tpu.memory_space<vmem>>, %arg9: memref<8x1xf32, #tpu.memory_space<vmem>>, %arg10: memref<8x1xf32, #tpu.memory_space<vmem>>, %arg11: memref<8x1xf32, #tpu.memory_space<vmem>>) attributes {dimension_semantics = [#tpu.dimension_semantics<parallel>, #tpu.dimension_semantics<arbitrary>], iteration_bounds = array<i64: 2, 3>, scalar_prefetch = 0 : i64, scratch_operands = 3 : i64, tpu.core_type = #tpu.core_type<tc>, window_params = [{transform_indices = @transform_0, window_bounds = array<i64: 8, 128>}, {transform_indices = @transform_1, window_bounds = array<i64: 8, 1>}, {transform_indices = @transform_2, window_bounds = array<i64: 8, 1>}, {transform_indices = @transform_3, window_bounds = array<i64: 8, 1>}, {transform_indices = @transform_4, window_bounds = array<i64: 8, 1>}, {transform_indices = @transform_5, window_bounds = array<i64: 8, 1>}, {transform_indices = @transform_6, window_bounds = array<i64: 8, 1>}]} {
    %c0_i32 = arith.constant 0 : i32
    %0 = arith.cmpi eq, %arg1, %c0_i32 : i32
    %1 = arith.extui %0 : i1 to i32
    %c0_i32_0 = arith.constant 0 : i32
    %2 = arith.cmpi ne, %1, %c0_i32_0 : i32
    scf.if %2 {
      %cst_39 = arith.constant 0xFF800000 : f32
      %75 = vector.broadcast %cst_39 : f32 to vector<8x1xf32>
      %c0_40 = arith.constant 0 : index
      %c0_41 = arith.constant 0 : index
      %76 = vector.load %arg9[%c0_40, %c0_41] : memref<8x1xf32, #tpu.memory_space<vmem>>, vector<8x1xf32>
      tpu.vector_store %arg9[%c0_40, %c0_41], %75 {strides = array<i32>} : memref<8x1xf32, #tpu.memory_space<vmem>>, vector<8x1xf32>,
      %cst_42 = arith.constant 0.000000e+00 : f32
      %77 = vector.broadcast %cst_42 : f32 to vector<8x1xf32>
      %c0_43 = arith.constant 0 : index
      %c0_44 = arith.constant 0 : index
      %78 = vector.load %arg10[%c0_43, %c0_44] : memref<8x1xf32, #tpu.memory_space<vmem>>, vector<8x1xf32>
      tpu.vector_store %arg10[%c0_43, %c0_44], %77 {strides = array<i32>} : memref<8x1xf32, #tpu.memory_space<vmem>>, vector<8x1xf32>,
      %cst_45 = arith.constant 0.000000e+00 : f32
      %79 = vector.broadcast %cst_45 : f32 to vector<8x1xf32>
      %c0_46 = arith.constant 0 : index
      %c0_47 = arith.constant 0 : index
      %80 = vector.load %arg11[%c0_46, %c0_47] : memref<8x1xf32, #tpu.memory_space<vmem>>, vector<8x1xf32>
      tpu.vector_store %arg11[%c0_46, %c0_47], %79 {strides = array<i32>} : memref<8x1xf32, #tpu.memory_space<vmem>>, vector<8x1xf32>,
    } else {
    }
    %c0 = arith.constant 0 : index
    %c0_1 = arith.constant 0 : index
    %3 = vector.load %arg2[%c0, %c0_1] : memref<8x128xf32, #tpu.memory_space<vmem>>, vector<8x128xf32>
    %c0_2 = arith.constant 0 : index
    %c0_3 = arith.constant 0 : index
    %4 = vector.load %arg3[%c0_2, %c0_3] : memref<8x1xi32, #tpu.memory_space<vmem>>, vector<8x1xi32>
    %c128_i32 = arith.constant 128 : i32
    %5 = arith.muli %arg1, %c128_i32 : i32
    %6 = tpu.iota {dimensions = array<i32: 1>} : vector<8x128xi32>
    %7 = vector.broadcast %5 : i32 to vector<8x128xi32>
    %8 = arith.addi %7, %6 : vector<8x128xi32>
    %9 = vector.broadcast %4 : vector<8x1xi32> to vector<8x128xi32>
    %10 = arith.cmpi eq, %8, %9 : vector<8x128xi32>
    %cst = arith.constant 0.000000e+00 : f32
    %11 = vector.broadcast %cst : f32 to vector<8x128xf32>
    %12 = arith.select %10, %3, %11 : vector<8x128xi1>, vector<8x128xf32>
    %cst_4 = arith.constant dense<0.000000e+00> : vector<8xf32>
    %13 = vector.multi_reduction <add>, %12, %cst_4 [1] : vector<8x128xf32> to vector<8xf32>
    %14 = vector.shape_cast %13 : vector<8xf32> to vector<8x1xf32>
    %15 = arith.mulf %14, %14 : vector<8x1xf32>
    %cst_5 = arith.constant 1.000000e+00 : f32
    %16 = vector.broadcast %cst_5 : f32 to vector<8x1xf32>
    %17 = arith.subf %16, %15 : vector<8x1xf32>
    %cst_6 = arith.constant 0.000000e+00 : f32
    %18 = vector.broadcast %cst_6 : f32 to vector<8x1xf32>
    %19 = arith.maximumf %17, %18 : vector<8x1xf32>
    %20 = math.sqrt %19 : vector<8x1xf32>
    %c0_7 = arith.constant 0 : index
    %c0_8 = arith.constant 0 : index
    %21 = vector.load %arg4[%c0_7, %c0_8] : memref<8x1xf32, #tpu.memory_space<vmem>>, vector<8x1xf32>
    %22 = arith.mulf %14, %21 : vector<8x1xf32>
    %c0_9 = arith.constant 0 : index
    %c0_10 = arith.constant 0 : index
    %23 = vector.load %arg5[%c0_9, %c0_10] : memref<8x1xf32, #tpu.memory_space<vmem>>, vector<8x1xf32>
    %24 = arith.mulf %20, %23 : vector<8x1xf32>
    %25 = arith.subf %22, %24 : vector<8x1xf32>
    %c0_11 = arith.constant 0 : index
    %c0_12 = arith.constant 0 : index
    %26 = vector.load %arg6[%c0_11, %c0_12] : memref<8x1xf32, #tpu.memory_space<vmem>>, vector<8x1xf32>
    %27 = arith.cmpf ogt, %14, %26 : vector<8x1xf32>
    %c0_13 = arith.constant 0 : index
    %c0_14 = arith.constant 0 : index
    %28 = vector.load %arg7[%c0_13, %c0_14] : memref<8x1xf32, #tpu.memory_space<vmem>>, vector<8x1xf32>
    %29 = arith.subf %14, %28 : vector<8x1xf32>
    %30 = arith.select %27, %25, %29 : vector<8x1xi1>, vector<8x1xf32>
    %31 = vector.shape_cast %30 : vector<8x1xf32> to vector<8x1xf32>
    %32 = vector.broadcast %31 : vector<8x1xf32> to vector<8x128xf32>
    %33 = arith.select %10, %32, %3 : vector<8x128xi1>, vector<8x128xf32>
    %cst_15 = arith.constant 3.000000e+01 : f32
    %34 = vector.broadcast %cst_15 : f32 to vector<8x128xf32>
    %35 = arith.mulf %34, %33 : vector<8x128xf32>
    %c300_i32 = arith.constant 300 : i32
    %36 = vector.broadcast %c300_i32 : i32 to vector<8x128xi32>
    %37 = arith.cmpi slt, %8, %36 : vector<8x128xi32>
    %cst_16 = arith.constant -1.000000e+30 : f32
    %38 = vector.broadcast %cst_16 : f32 to vector<8x128xf32>
    %39 = arith.select %37, %35, %38 : vector<8x128xi1>, vector<8x128xf32>
    %c128_i32_17 = arith.constant 128 : i32
    %40 = arith.muli %arg1, %c128_i32_17 : i32
    %41 = vector.broadcast %40 : i32 to vector<8x1xi32>
    %42 = arith.cmpi sge, %4, %41 : vector<8x1xi32>
    %c128_i32_18 = arith.constant 128 : i32
    %43 = arith.muli %arg1, %c128_i32_18 : i32
    %c128_i32_19 = arith.constant 128 : i32
    %44 = arith.addi %43, %c128_i32_19 : i32
    %45 = vector.broadcast %44 : i32 to vector<8x1xi32>
    %46 = arith.cmpi slt, %4, %45 : vector<8x1xi32>
    %47 = arith.andi %42, %46 : vector<8x1xi1>
    %c0_20 = arith.constant 0 : index
    %c0_21 = arith.constant 0 : index
    %48 = vector.load %arg11[%c0_20, %c0_21] : memref<8x1xf32, #tpu.memory_space<vmem>>, vector<8x1xf32>
    %cst_22 = arith.constant 3.000000e+01 : f32
    %49 = vector.broadcast %cst_22 : f32 to vector<8x1xf32>
    %50 = arith.mulf %49, %30 : vector<8x1xf32>
    %cst_23 = arith.constant 0.000000e+00 : f32
    %51 = vector.broadcast %cst_23 : f32 to vector<8x1xf32>
    %52 = arith.select %47, %50, %51 : vector<8x1xi1>, vector<8x1xf32>
    %53 = arith.addf %48, %52 : vector<8x1xf32>
    %c0_24 = arith.constant 0 : index
    %c0_25 = arith.constant 0 : index
    %54 = vector.load %arg11[%c0_24, %c0_25] : memref<8x1xf32, #tpu.memory_space<vmem>>, vector<8x1xf32>
    tpu.vector_store %arg11[%c0_24, %c0_25], %53 {strides = array<i32>} : memref<8x1xf32, #tpu.memory_space<vmem>>, vector<8x1xf32>,
    %cst_26 = arith.constant dense<0xFF800000> : vector<8xf32>
    %55 = vector.multi_reduction <maximumf>, %39, %cst_26 [1] : vector<8x128xf32> to vector<8xf32>
    %56 = vector.shape_cast %55 : vector<8xf32> to vector<8x1xf32>
    %c0_27 = arith.constant 0 : index
    %c0_28 = arith.constant 0 : index
    %57 = vector.load %arg9[%c0_27, %c0_28] : memref<8x1xf32, #tpu.memory_space<vmem>>, vector<8x1xf32>
    %58 = arith.maximumf %57, %56 : vector<8x1xf32>
    %c0_29 = arith.constant 0 : index
    %c0_30 = arith.constant 0 : index
    %59 = vector.load %arg10[%c0_29, %c0_30] : memref<8x1xf32, #tpu.memory_space<vmem>>, vector<8x1xf32>
    %c0_31 = arith.constant 0 : index
    %c0_32 = arith.constant 0 : index
    %60 = vector.load %arg9[%c0_31, %c0_32] : memref<8x1xf32, #tpu.memory_space<vmem>>, vector<8x1xf32>
    %61 = arith.subf %60, %58 : vector<8x1xf32>
    %62 = math.exp %61 : vector<8x1xf32>
    %63 = arith.mulf %59, %62 : vector<8x1xf32>
    %64 = vector.broadcast %58 : vector<8x1xf32> to vector<8x128xf32>
    %65 = arith.subf %39, %64 : vector<8x128xf32>
    %66 = math.exp %65 : vector<8x128xf32>
    %cst_33 = arith.constant dense<0.000000e+00> : vector<8xf32>
    %67 = vector.multi_reduction <add>, %66, %cst_33 [1] : vector<8x128xf32> to vector<8xf32>
    %68 = vector.shape_cast %67 : vector<8xf32> to vector<8x1xf32>
    %69 = arith.addf %63, %68 : vector<8x1xf32>
    %c0_34 = arith.constant 0 : index
    %c0_35 = arith.constant 0 : index
    %70 = vector.load %arg10[%c0_34, %c0_35] : memref<8x1xf32, #tpu.memory_space<vmem>>, vector<8x1xf32>
    tpu.vector_store %arg10[%c0_34, %c0_35], %69 {strides = array<i32>} : memref<8x1xf32, #tpu.memory_space<vmem>>, vector<8x1xf32>,
    %c0_36 = arith.constant 0 : index
    %c0_37 = arith.constant 0 : index
    %71 = vector.load %arg9[%c0_36, %c0_37] : memref<8x1xf32, #tpu.memory_space<vmem>>, vector<8x1xf32>
    tpu.vector_store %arg9[%c0_36, %c0_37], %58 {strides = array<i32>} : memref<8x1xf32, #tpu.memory_space<vmem>>, vector<8x1xf32>,
    %c2_i32 = arith.constant 2 : i32
    %72 = arith.cmpi eq, %arg1, %c2_i32 : i32
    %73 = arith.extui %72 : i1 to i32
    %c0_i32_38 = arith.constant 0 : i32
    %74 = arith.cmpi ne, %73, %c0_i32_38 : i32
    scf.if %74 {
      %c0_39 = arith.constant 0 : index
      %c0_40 = arith.constant 0 : index
      %75 = vector.load %arg9[%c0_39, %c0_40] : memref<8x1xf32, #tpu.memory_space<vmem>>, vector<8x1xf32>
      %c0_41 = arith.constant 0 : index
      %c0_42 = arith.constant 0 : index
      %76 = vector.load %arg10[%c0_41, %c0_42] : memref<8x1xf32, #tpu.memory_space<vmem>>, vector<8x1xf32>
      %77 = math.log %76 : vector<8x1xf32>
      %78 = arith.addf %75, %77 : vector<8x1xf32>
      %c0_43 = arith.constant 0 : index
      %c0_44 = arith.constant 0 : index
      %79 = vector.load %arg11[%c0_43, %c0_44] : memref<8x1xf32, #tpu.memory_space<vmem>>, vector<8x1xf32>
      %80 = arith.subf %78, %79 : vector<8x1xf32>
      %c0_45 = arith.constant 0 : index
      %c0_46 = arith.constant 0 : index
      %81 = vector.load %arg8[%c0_45, %c0_46] : memref<8x1xf32, #tpu.memory_space<vmem>>, vector<8x1xf32>
      tpu.vector_store %arg8[%c0_45, %c0_46], %80 {strides = array<i32>} : memref<8x1xf32, #tpu.memory_space<vmem>>, vector<8x1xf32>,
    } else {
    }
    return
  }
  func.func @transform_0(%arg0: i32, %arg1: i32) -> (i32, i32) {
    %c0_i32 = arith.constant 0 : i32
    return %arg0, %arg1 : i32, i32
  }
  func.func @transform_1(%arg0: i32, %arg1: i32) -> (i32, i32) {
    %c0_i32 = arith.constant 0 : i32
    %c0_i32_0 = arith.constant 0 : i32
    return %arg0, %c0_i32 : i32, i32
  }
  func.func @transform_2(%arg0: i32, %arg1: i32) -> (i32, i32) {
    %c0_i32 = arith.constant 0 : i32
    %c0_i32_0 = arith.constant 0 : i32
    return %arg0, %c0_i32 : i32, i32
  }
  func.func @transform_3(%arg0: i32, %arg1: i32) -> (i32, i32) {
    %c0_i32 = arith.constant 0 : i32
    %c0_i32_0 = arith.constant 0 : i32
    return %arg0, %c0_i32 : i32, i32
  }
  func.func @transform_4(%arg0: i32, %arg1: i32) -> (i32, i32) {
    %c0_i32 = arith.constant 0 : i32
    %c0_i32_0 = arith.constant 0 : i32
    return %arg0, %c0_i32 : i32, i32
  }
  func.func @transform_5(%arg0: i32, %arg1: i32) -> (i32, i32) {
    %c0_i32 = arith.constant 0 : i32
    %c0_i32_0 = arith.constant 0 : i32
    return %arg0, %c0_i32 : i32, i32
  }
  func.func @transform_6(%arg0: i32, %arg1: i32) -> (i32, i32) {
    %c0_i32 = arith.constant 0 : i32
    %c0_i32_0 = arith.constant 0 : i32
    return %arg0, %c0_i32 : i32, i32
  }
}

</mosaic_0001>

<bundles_post_ra>
// kernel: arcface_loss_adaptive_margin.1
= control target key start
LH: loop header
LB: loop body
LE: loop exit
PB: predicated region body
PF: predicated region fallthrough
CT: control target
= control target key end

     0   :  { %s733_s21 = smov 0   ;;  %s735_s22 = smov 0   ;;  %s851_s0 = inlined_call_operand.vmem [shape: f32[16,300], index: 0, kind: input, shape index: {}]   ;;  %s852_s1 = inlined_call_operand.vmem [shape: s32[16,1], index: 1, kind: input, shape index: {}]   ;;  %s853_s2 = inlined_call_operand.vmem [shape: f32[16,1], index: 2, kind: input, shape index: {}]   ;;  %s854_s3 = inlined_call_operand.vmem [shape: f32[16,1], index: 3, kind: input, shape index: {}]   ;;  %s855_s4 = inlined_call_operand.vmem [shape: f32[16,1], index: 4, kind: input, shape index: {}]   ;;  %s856_s5 = inlined_call_operand.vmem [shape: f32[16,1], index: 5, kind: input, shape index: {}]   ;;  %s857_s6 = inlined_call_operand.vmem [shape: f32[16,1], index: 6, kind: output, shape index: {}]  }
   0x1   :  { %858 = sst [smem:[#allocation7_spill]] %s852_s1  ;;  %s737_s23 = smov 0  }
   0x2   :  { %s739_s24 = smov 0   ;;  %s741_s25 = smov 0  }
   0x3 LB: > { %s25_s26 = sadd.s32 1, %s685_s23  ;;  %s28_s27 = sadd.s32 1, %s689_s24  ;;  %s693_s25 = sphi %s741_s25, %s16_s25   ;;  %s689_s24 = sphi %s739_s24, %s869_s24   ;;  %s685_s23 = sphi %s737_s23, %s868_s23   ;;  %s681_s22 = sphi %s735_s22, %s867_s22   ;;  %s677_s21 = sphi %s733_s21, %s866_s21  }
   0x4   : > { %p26_p0 = scmp.ge.s32.totalorder %s25_s26, 3  ;;  %p588_p1 = scmp.ge.s32.totalorder %s693_s25, 1 }
   0x5   : > { %p274_p2 = scmp.lt.s32.totalorder %s693_s25, 7 }
   0x6   : > { %s871_s26 = smov (%p26_p0, %s25_s26), 0  ;;  %s873_s27 = smov (!%p26_p0, %s28_s27), %s689_s24 }
   0x7   : > { %859 = sst [smem:[#allocation5_spill]] %s871_s26  ;;  %p275_p3 = pnand %p588_p1, %p274_p2 }
   0x8   : > { %p30_p4 = scmp.ge.s32.totalorder %s873_s27, 2  ;;  %p326_p5 = scmp.lt.s32.totalorder (!%p275_p3), %s681_s22, 1 }
   0x9   : > { %278 = sbr.rel (%p275_p3) target bundleno = 919 (0x397), region = 44  ;;  %p328_p6 = scmp.lt.s32.totalorder (!%p275_p3), %s677_s21, 2 }
   0xa   : > { %s875_s27 = smov (%p30_p4, %s873_s27), 0  ;;  %s861_s1 = sld [smem:[#allocation7_spill]] (!%p275_p3) }
   0xb   : > { %860 = sst [smem:[#allocation6_spill]] %s875_s27  ;;  %p596_p7 = scmp.ne.s32.totalorder (!%p275_p3), %s677_s21, 0 }
  0x10   : > { %s877_s22 = smov (!%p326_p5, %s681_s22), 1  ;;  %vm362_vm0 = vcmask (!%p596_p7), 7168   ;;  %v695_v0 = vmov (!%p596_p7), -inf   ;;  %v696_v1 = vmov (!%p596_p7), 0.0  }
  0x11   : > { %s329_s28 = scalar_select %p328_p6, %s677_s21, 2 }
  0x12   : > { %s601_s29 = smul.u32 3, %s877_s22  ;;  %s767_s30 = sshll.u32 %s877_s22, 3  ;;  %363 = vst.msk [vmem:[#allocation2] sm:$0xff] (!%p596_p7), %vm362_vm0, %v695_v0  ;;  %364 = vst.msk [vmem:[#allocation3] sm:$0xff] (!%p596_p7), %vm362_vm0, %v696_v1 }
  0x13   : > { %s337_s9 = scalar_lea.vmem %s861_s1, %s767_s30  ;;  %s341_s12 = scalar_lea.vmem %s853_s2, %s767_s30  ;;  %365 = vst.msk [vmem:[#allocation4] sm:$0xff] (!%p596_p7), %vm362_vm0, %v696_v1 }
  0x14   : > { %s331_s13 = sadd.s32 %s601_s29, %s329_s28  ;;  %s345_s16 = scalar_lea.vmem %s854_s3, %s767_s30 }
  0x15   : > { %s589_s17 = sshll.u32 %s331_s13, 3  ;;  %s349_s20 = scalar_lea.vmem %s855_s4, %s767_s30 }
  0x16   : > { %s333_s8 = scalar_lea.vmem %s851_s0, %s589_s17  ;;  %s353_s26 = scalar_lea.vmem %s856_s5, %s767_s30 }
  0x17   : > { %s357_s28 = scalar_lea.vmem %s857_s6, %s767_s30  ;;  %361 = sbr.rel (%p596_p7) target bundleno = 30 (0x1e), region = 48 }
  0x1e PF: > { %v367_v2 = vld [vmem:[%s337_s9] sm:$0xff]  ;;  %s597_s29 = sshll.u32 %s677_s21, 7  ;;  %v697_v3 = vmov 0   ;;  %v369_v6 = vlaneseq  ;;  %v414_v31 = vld [vmem:[#allocation4] sm:$0xff]  ;;  %vm418_vm8 = vcmask 7168   ;;  %v424_v49 = vld [vmem:[#allocation3] sm:$0xff] }
  0x1f   : > { %645 = vset.pattern.permute.xlu0 %v697_v3  ;;  %s410_s1 = sadd.s32 128, %s597_s29  ;;  %v371_v4 = vstv %s597_s29  ;;  %646 = vset.pattern.permute.xlu1 %v697_v3  ;;  %v366_v9 = vld [vmem:[%s333_s8] sm:$0xff]  ;;  %p598_p8 = scmp.ne.s32.totalorder %s677_s21, 2 }
  0x20   : > { %v411_v5 = vstv %s410_s1  ;;  %374 = vperm.xlu0 %645, %v367_v2   ;;  %vm409_vm1 = vcmp.ge.s32.totalorder %v367_v2, %v371_v4  ;;  %v370_v7 = vand.u32 127, %v369_v6  ;;  %v390_v19 = vld [vmem:[%s341_s12] sm:$0xff] }
  0x21   : > { %vm412_vm2 = vcmp.lt.s32.totalorder %v367_v2, %v411_v5  ;;  %v392_v21 = vld [vmem:[%s345_s16] sm:$0xff] }
  0x22   : > { %v372_v8 = vadd.s32 %v371_v4, %v370_v7  ;;  %vm799_vm4 = vmand %vm409_vm1, %vm412_vm2  ;;  %v397_v24 = vld [vmem:[%s353_s26] sm:$0xff] }
  0x23   : > { %v395_v27 = vld [vmem:[%s349_s20] sm:$0xff] }
  0x24   : > { %vm407_vm9 = vcmp.lt.s32.totalorder %v372_v8, 300  ;;  %v422_v39 = vld [vmem:[#allocation2] sm:$0xff] }
  0x9f   : > { %v375_v10 = vpop.permute.xlu0 %374 }
  0xa0   : > { %vm376_vm3 = vcmp.eq.s32.totalorder %v372_v8, %v375_v10 }
  0xa1   : > { %v377_v11 = vsel %vm376_vm3, %v366_v9, 0.0 }
  0xa2   : > { %378 = vadd.xlane.f32.xlu0 %v377_v11 }
 0x12f   : > { %v379_v13 = vpop.xlane.xlu0 %378 }
 0x130   : > { %v380_v14 = vmul.f32 %v379_v13, %v379_v13  ;;  %v391_v25 = vmul.f32 %v390_v19, %v379_v13  ;;  %v398_v29 = vsub.f32 %v379_v13, %v397_v24  ;;  %vm396_vm7 = vcmp.gt.f32.partialorder %v379_v13, %v395_v27 }
 0x132   : > { %v381_v15 = vsub.f32 1.0, %v380_v14 }
 0x134   : > { %v382_v16 = vmax.f32 %v381_v15, 0.0 }
 0x136   : > { %647 = vrsqrt.f32 %v382_v16  ;;  %vm385_vm5 = vcmp.eq.f32.partialorder %v382_v16, inf  ;;  %v388_v20 = vand.u32 2147483648, %v382_v16  ;;  %vm387_vm6 = vcmp.eq.f32.partialorder %v382_v16, 0.0 }
 0x140   : > { %v648_v17 = vpop.eup %647 }
 0x141   : > { %v384_v18 = vmul.f32 %v648_v17, %v382_v16 }
 0x143   : > { %v386_v22 = vsel %vm385_vm5, %v382_v16, %v384_v18 }
 0x144   : > { %v389_v23 = vsel %vm387_vm6, %v388_v20, %v386_v22 }
 0x145   : > { %v393_v26 = vmul.f32 %v392_v21, %v389_v23 }
 0x147   : > { %v394_v28 = vsub.f32 %v391_v25, %v393_v26 }
 0x149   : > { %v399_v30 = vsel %vm396_vm7, %v394_v28, %v398_v29 }
 0x14a   : > { %402 = vperm.xlu1 %646, %v399_v30   ;;  %v415_v32 = vmul.f32 30.0, %v399_v30 }
 0x14c   : > { %v416_v33 = vsel %vm799_vm4, %v415_v32, 0.0 }
 0x14d   : > { %v417_v34 = vadd.f32 %v416_v33, %v414_v31 }
 0x14f   : > { %419 = vst.msk [vmem:[#allocation4] sm:$0xff] %vm418_vm8, %v417_v34 }
 0x156   : > { %v451_v57 = vld [vmem:[#allocation4] sm:$0xff] (!%p598_p8) }
 0x1c9   : > { %v403_v35 = vpop.permute.xlu1 %402 }
 0x1ca   : > { %v405_v36 = vsel %vm376_vm3, %v403_v35, %v366_v9 }
 0x1cb   : > { %v406_v37 = vmul.f32 30.0, %v405_v36 }
 0x1cd   : > { %v408_v38 = vsel %vm407_vm9, %v406_v37, -1e+30 }
 0x1ce   : > { %420 = vmax.xlane.f32.xlu1 %v408_v38 }
 0x25b   : > { %v421_v40 = vpop.xlane.xlu1 %420 }
 0x25c   : > { %v423_v41 = vmax.f32 %v422_v39, %v421_v40 }
 0x25e   : > { %v425_v42 = vsub.f32 %v422_v39, %v423_v41  ;;  %441 = vst.msk [vmem:[#allocation2] sm:$0xff] %vm418_vm8, %v423_v41  ;;  %431 = vperm.xlu0 %645, %v423_v41  }
 0x260   : > { %v426_v47 = vmul.f32 1.442695, %v425_v42 }
 0x265   : > { %v446_v55 = vld [vmem:[#allocation2] sm:$0xff] (!%p598_p8) }
 0x2dd   : > { %v432_v43 = vpop.permute.xlu0 %431 }
 0x2de   : > { %v434_v44 = vsub.f32 %v408_v38, %v432_v43 }
 0x2e0   : > { %v435_v45 = vmul.f32 1.442695, %v434_v44 }
 0x2e2   : > { %649 = vpow2.f32 %v435_v45 }
 0x2e3   : > { %651 = vpow2.f32 %v426_v47 }
 0x2ec   : > { %v650_v46 = vpop.eup %649 }
 0x2ed   : > { %437 = vadd.xlane.f32.xlu1 %v650_v46  ;;  %v652_v48 = vpop.eup %651 }
 0x2ee   : > { %v428_v50 = vmul.f32 %v652_v48, %v424_v49 }
 0x377   : > { %445 = sbr.rel (%p598_p8) target bundleno = 919 (0x397), region = 52 }
 0x37a   : > { %v438_v51 = vpop.xlane.xlu1 %437 }
 0x37b   : > { %v439_v52 = vadd.f32 %v438_v51, %v428_v50 }
 0x37d   : > { %440 = vst.msk [vmem:[#allocation3] sm:$0xff] %vm418_vm8, %v439_v52 }
 0x384   : > { %v447_v53 = vld [vmem:[#allocation3] sm:$0xff] }
 0x385   : > { %653 = vlog2.f32 %v447_v53 }
 0x38f   : > { %v654_v54 = vpop.eup %653 }
 0x390   : > { %v449_v56 = vmul.f32 0.6931472, %v654_v54 }
 0x392   : > { %v450_v58 = vadd.f32 %v449_v56, %v446_v55 }
 0x394   : > { %v452_v59 = vsub.f32 %v450_v58, %v451_v57 }
 0x396   : > { %453 = vst.msk [vmem:[%s357_s28] sm:$0xff] %vm418_vm8, %v452_v59 }
 0x397 PF: > { %s16_s25 = sadd.s32 1, %s693_s25   ;;  %s864_s16 = sld [smem:[#allocation5_spill]] }
 0x398   : > { %p13_p9 = scmp.ge.s32.totalorder %s16_s25, 8   ;;  %s865_s20 = sld [smem:[#allocation6_spill]] }
 0x399   : > { %s866_s21 = smov %s685_s23  ;;  %s867_s22 = smov %s689_s24 }
 0x39a   :  { %15 = sbr.rel (!%p13_p9) target bundleno = 3 (0x3), region = 97 }
 0x39d   : > { %s868_s23 = smov %s864_s16 }
 0x39e   : > { %s869_s24 = smov %s865_s20 }

</bundles_post_ra>
